<compile_context>
chip_gen: v7x
topology: tpu7x:2x2x1
jax: 0.10.0
libtpu: 0.0.40
codegen_flags: <defaults>
</compile_context>

<pallas_src>
import functools

import jax
import jax.numpy as jnp
import numpy as np
from jax.experimental import pallas as pl
from jax.experimental.pallas import tpu as pltpu


# ----------------------------------------------------------------------------
# Bilinear interpolation matrices (PyTorch F.interpolate, align_corners=False)
# ----------------------------------------------------------------------------
def bilinear_matrix(in_size: int, out_size: int) -> jnp.ndarray:
    """Returns W of shape (out_size, in_size) s.t. y = W @ x is 1-D bilinear resize."""
    scale = in_size / out_size
    i = jnp.arange(out_size, dtype=jnp.float32)
    src = (i + 0.5) * scale - 0.5
    src = jnp.maximum(src, 0.0)                       # PyTorch clamps negative coords
    x0 = jnp.floor(src).astype(jnp.int32)
    x1 = jnp.minimum(x0 + 1, in_size - 1)
    w1 = src - x0.astype(jnp.float32)
    w0 = 1.0 - w1
    cols = jnp.arange(in_size, dtype=jnp.int32)
    W = (w0[:, None] * (cols[None, :] == x0[:, None]).astype(jnp.float32)
         + w1[:, None] * (cols[None, :] == x1[:, None]).astype(jnp.float32))
    return W.astype(jnp.float32)


def _pool_vectors(H: int, W: int, out_hw: int = 224):
    """Fold (bilinear resize -> out_hw x out_hw) + global-average-pool into 1-D vectors."""
    wh = bilinear_matrix(H, out_hw)                   # (224, H)
    ww = bilinear_matrix(W, out_hw)                   # (224, W)
    ah = jnp.sum(wh, axis=0) / float(out_hw)          # (H,)
    aw = jnp.sum(ww, axis=0) / float(out_hw)          # (W,)
    return ah, aw


# ----------------------------------------------------------------------------
# Tiling helpers
# ----------------------------------------------------------------------------
def _choose_tb(B: int, bytes_per_row: int, *, budget_bytes: int, cap: int) -> int:
    """Pick a batch tile so the double-buffered input block stays within budget."""
    tb = max(1, budget_bytes // max(2 * bytes_per_row, 1))
    tb = min(tb, cap)
    if tb >= B:
        return B                      # single block covering the whole (un-padded) batch
    return max(8, (tb // 8) * 8)      # (8,128) sublane rule on the (B, K) logits blocks


def _round_up(n: int, m: int) -> int:
    return ((n + m - 1) // m) * m


def _pad_rows(a, n_rows: int, value=0):
    pad = n_rows - a.shape[0]
    if pad == 0:
        return a
    cfg = ((0, pad),) + ((0, 0),) * (a.ndim - 1)
    return jnp.pad(a, cfg, constant_values=value)


# ----------------------------------------------------------------------------
# Fused kernel: teacher (folded resize+GAP+Linear) + base CE + distillation loss
# Grid: one axis over batch tiles (reduction -> "arbitrary"); dense VMEM accumulators.
# ----------------------------------------------------------------------------
def _make_distill_kernel(alpha: float, tau: float, dist_type: str, batch: int):
    assert dist_type in ("soft", "hard")
    B = batch

    def kernel(x_ref, aw_ref, m2_ref, bt_ref, s_ref, skd_ref, lab_ref,
               o_ref, base_acc, dist_acc):
        step = pl.program_id(0)

        @pl.when(step == 0)
        def _():
            base_acc[...] = jnp.zeros_like(base_acc)
            dist_acc[...] = jnp.zeros_like(dist_acc)

        s = s_ref[...].astype(jnp.float32)       # student logits       (TB, K)
        skd = skd_ref[...].astype(jnp.float32)   # distillation logits  (TB, K)
        lab = lab_ref[...]                       # labels               (TB, 1) int32
        TB, K = s.shape
        iota = jax.lax.broadcasted_iota(jnp.int32, (TB, K), 1)

        def log_softmax(z):
            m = jnp.max(z, axis=1, keepdims=True)
            return z - (jnp.log(jnp.sum(jnp.exp(z - m), axis=1, keepdims=True)) + m)

        # ---- base cross-entropy: lane-dense element-wise accumulate ------------
        # (padded rows have label == K -> onehot is all-zero -> contribute 0)
        onehot = (iota == lab).astype(jnp.float32)
        base_acc[...] += -(onehot * log_softmax(s))

        # ---- teacher: folded bilinear-resize(224) + GAP + Linear ----------------
        x = x_ref[...].astype(jnp.float32)                                    # (TB, C*H, W)
        aw = aw_ref[...]                                                      # (1, W)
        xw = jnp.sum(x * aw[None, :, :], axis=-1)                             # (TB, C*H)
        t = (jnp.dot(xw, m2_ref[...], preferred_element_type=jnp.float32)
             + bt_ref[...])                                                   # (TB, K)

        valid = (lab < K).astype(jnp.float32)                                 # (TB, 1)

        # ---- distillation: lane-dense element-wise accumulate -------------------
        if dist_type == "soft":
            log_s = log_softmax(skd / tau)
            log_t = log_softmax(t / tau)
            dist_acc[...] += valid * (jnp.exp(log_t) * (log_t - log_s))
        else:  # "hard": CE against teacher argmax (first-max tie-break)
            tmax = jnp.max(t, axis=1, keepdims=True)
            idx = jnp.min(jnp.where(t == tmax, iota, K), axis=1, keepdims=True)
            oh_t = (iota == idx).astype(jnp.float32)
            dist_acc[...] += -(valid * oh_t * log_softmax(skd))

        @pl.when(step == pl.num_programs(0) - 1)
        def _():
            base = jnp.sum(base_acc[...]) / float(B)
            if dist_type == "soft":
                dist = jnp.sum(dist_acc[...]) * (tau * tau) / float(B * K)
            else:
                dist = jnp.sum(dist_acc[...]) / float(B)
            o_ref[...] = (base * (1.0 - alpha) + dist * alpha).reshape(1, 1)

    return kernel


# ----------------------------------------------------------------------------
# 'none' specialization: base cross-entropy only (no resize / teacher at all)
# ----------------------------------------------------------------------------
def _make_base_kernel(batch: int):
    B = batch

    def kernel(s_ref, lab_ref, o_ref, base_acc):
        step = pl.program_id(0)

        @pl.when(step == 0)
        def _():
            base_acc[...] = jnp.zeros_like(base_acc)

        s = s_ref[...].astype(jnp.float32)
        lab = lab_ref[...]
        TB, K = s.shape
        iota = jax.lax.broadcasted_iota(jnp.int32, (TB, K), 1)
        m = jnp.max(s, axis=1, keepdims=True)
        logp = s - (jnp.log(jnp.sum(jnp.exp(s - m), axis=1, keepdims=True)) + m)
        onehot = (iota == lab).astype(jnp.float32)
        base_acc[...] += -(onehot * logp)

        @pl.when(step == pl.num_programs(0) - 1)
        def _():
            o_ref[...] = (jnp.sum(base_acc[...]) / float(B)).reshape(1, 1)

    return kernel


# ----------------------------------------------------------------------------
# Full DistillationLoss forward
# ----------------------------------------------------------------------------
@functools.partial(jax.jit,
                   static_argnames=("alpha", "tau", "dist_type", "tb_override"))
def distillation_loss_forward(inputs, outputs, labels, wt, bt, *,
                              alpha, tau, dist_type, tb_override=None):
    # outputs may be a (outputs, outputs_kd) tuple, mirroring the PyTorch module.
    if isinstance(outputs, (tuple, list)):
        outputs, outputs_kd = outputs
    else:
        outputs_kd = outputs

    B, K = outputs.shape
    labels2d = labels.astype(jnp.int32).reshape(B, 1)

    if dist_type == "none":
        # PyTorch module returns base_loss before ever calling the teacher.
        TB = tb_override or _choose_tb(B, K * 4, budget_bytes=4 << 20, cap=512)
        B_pad = _round_up(B, TB)
        s = _pad_rows(outputs, B_pad)
        lab = _pad_rows(labels2d, B_pad, value=K)     # sentinel -> onehot == 0
        out = pl.pallas_call(
            _make_base_kernel(B),
            out_shape=jax.ShapeDtypeStruct((1, 1), jnp.float32),
            grid=(B_pad // TB,),
            in_specs=[
                pl.BlockSpec((TB, K), lambda i: (i, 0)),
                pl.BlockSpec((TB, 1), lambda i: (i, 0)),
            ],
            out_specs=pl.BlockSpec((1, 1), lambda i: (0, 0)),
            scratch_shapes=[pltpu.VMEM((TB, K), jnp.float32)],
            compiler_params=pltpu.CompilerParams(
                dimension_semantics=("arbitrary",),
                vmem_limit_bytes=32 << 20),
            cost_estimate=pl.CostEstimate(
                flops=int(8 * B_pad * K),
                transcendentals=int(2 * B_pad * K),
                bytes_accessed=int(B_pad * K * outputs.dtype.itemsize + B_pad * 4)),
        )(s, lab)
        return out[0, 0]

    N, C, H, W = inputs.shape
    itemsize = inputs.dtype.itemsize

    # Batch tile from a VMEM byte budget for the double-buffered input block
    # (~8 MiB target -> large DMAs, few grid steps), padded batch instead of tiny TB.
    TB = tb_override or _choose_tb(B, C * H * W * itemsize, budget_bytes=8 << 20, cap=64)
    B_pad = _round_up(B, TB)

    # Fold bilinear resize->(224,224), GAP and the teacher weight into one
    # lane-dense (C*H, K) matrix M2 plus the width pool vector aw.
    ah, aw = _pool_vectors(H, W)
    aw2 = aw.reshape(1, W)
    m2 = (wt.astype(jnp.float32)[:, None, :] * ah[None, :, None]).reshape(C * H, K)
    bt2 = bt.astype(jnp.float32).reshape(1, K)

    x3 = _pad_rows(inputs.reshape(N, C * H, W), B_pad)   # metadata reshape; cast in-kernel
    s = _pad_rows(outputs, B_pad)
    skd = _pad_rows(outputs_kd, B_pad)
    lab = _pad_rows(labels2d, B_pad, value=K)            # sentinel -> masked in kernel

    # Explicit scoped-VMEM limit (v5e default is only 16 MiB; stay well under v7x's 64 MiB).
    x_block = TB * C * H * W * itemsize
    logit_block = TB * K * 4
    weights = (C * H) * K * 4 + W * 4 + K * 4
    accs = 2 * TB * K * 4
    vmem_est = 2 * x_block + 4 * logit_block + 2 * TB * 4 + weights + accs
    vmem_limit = int(min(max(2 * vmem_est + (4 << 20), 32 << 20), 60 << 20))

    cost = pl.CostEstimate(
        flops=int(2 * B_pad * C * H * (W + K) + 16 * B_pad * K),
        transcendentals=int(4 * B_pad * K),
        bytes_accessed=int(B_pad * C * H * W * itemsize
                           + 2 * B_pad * K * outputs.dtype.itemsize
                           + B_pad * 4 + (C * H) * K * 4),
    )

    out = pl.pallas_call(
        _make_distill_kernel(alpha, tau, dist_type, B),
        out_shape=jax.ShapeDtypeStruct((1, 1), jnp.float32),
        grid=(B_pad // TB,),
        in_specs=[
            pl.BlockSpec((TB, C * H, W), lambda i: (i, 0, 0)),   # inputs tile
            pl.BlockSpec((1, W), lambda i: (0, 0)),              # aw (width pool vec)
            pl.BlockSpec((C * H, K), lambda i: (0, 0)),          # folded ah ⊗ wt
            pl.BlockSpec((1, K), lambda i: (0, 0)),              # teacher bias
            pl.BlockSpec((TB, K), lambda i: (i, 0)),             # student outputs
            pl.BlockSpec((TB, K), lambda i: (i, 0)),             # distillation outputs
            pl.BlockSpec((TB, 1), lambda i: (i, 0)),             # labels
        ],
        out_specs=pl.BlockSpec((1, 1), lambda i: (0, 0)),
        scratch_shapes=[pltpu.VMEM((TB, K), jnp.float32),        # base CE accumulator
                        pltpu.VMEM((TB, K), jnp.float32)],       # distillation accumulator
        compiler_params=pltpu.CompilerParams(
            dimension_semantics=("arbitrary",),
            vmem_limit_bytes=vmem_limit),
        cost_estimate=cost,
    )(x3, aw2, m2, bt2, s, skd, lab)
    return out[0, 0]


# ----------------------------------------------------------------------------
# Pure-JAX reference (materializes the 224x224 resize; verifies the fold)
# ----------------------------------------------------------------------------
def reference_loss(inputs, outputs, outputs_kd, labels, wt, bt, alpha, tau, dist_type):
    N, C, H, W = inputs.shape
    logp = jax.nn.log_softmax(outputs, axis=1)
    base = -jnp.mean(logp[jnp.arange(N), labels])
    if dist_type == "none":
        return base
    wh = bilinear_matrix(H, 224)
    ww = bilinear_matrix(W, 224)
    x224 = jnp.einsum("oh,nchw,pw->ncop", wh, inputs.astype(jnp.float32), ww)
    pooled = jnp.mean(x224, axis=(2, 3))
    t = pooled @ wt + bt
    if dist_type == "soft":
        log_s = jax.nn.log_softmax(outputs_kd / tau, axis=1)
        log_t = jax.nn.log_softmax(t / tau, axis=1)
        dist = jnp.sum(jnp.exp(log_t) * (log_t - log_s)) * tau * tau / outputs_kd.size
    else:
        hard = jnp.argmax(t, axis=1)
        logp_kd = jax.nn.log_softmax(outputs_kd, axis=1)
        dist = -jnp.mean(logp_kd[jnp.arange(N), hard])
    return base * (1.0 - alpha) + dist * alpha


# ----------------------------------------------------------------------------
if __name__ == "__main__":
    key = jax.random.PRNGKey(0)
    k = jax.random.split(key, 9)

    NUM_CLASSES = 10
    ALPHA, TAU = 0.5, 2.0
    C, H, W = 3, 16, 16

    # deterministic synthetic teacher parameters (GAP + Linear(C -> NUM_CLASSES))
    wt = (jax.random.normal(k[4], (C, NUM_CLASSES), dtype=jnp.float32)
          / jnp.sqrt(float(C)))
    bt = 0.01 * jax.random.normal(k[5], (NUM_CLASSES,), dtype=jnp.float32)

    # ---- case 1: tiny batch, single tile -----------------------------------
    B = 2
    inputs = jax.random.normal(k[0], (B, C, H, W), dtype=jnp.float32)
    outputs = jax.random.normal(k[1], (B, NUM_CLASSES), dtype=jnp.float32)
    outputs_kd = jax.random.normal(k[2], (B, NUM_CLASSES), dtype=jnp.float32)
    labels = jax.random.randint(k[3], (B,), 0, NUM_CLASSES, dtype=jnp.int32)

    for dist_type in ("soft", "hard", "none"):
        loss = distillation_loss_forward(inputs, (outputs, outputs_kd), labels, wt, bt,
                                         alpha=ALPHA, tau=TAU, dist_type=dist_type)
        loss = jax.block_until_ready(loss)
        ref = jax.block_until_ready(
            reference_loss(inputs, outputs, outputs_kd, labels, wt, bt,
                           ALPHA, TAU, dist_type))
        np.testing.assert_allclose(np.asarray(loss), np.asarray(ref),
                                   rtol=1e-2, atol=1e-2)

    # ---- case 2: exercises the padded-batch path (B=12, TB=8 -> pad to 16) --
    B2 = 12
    inputs2 = jax.random.normal(k[6], (B2, C, H, W), dtype=jnp.float32)
    outputs2 = jax.random.normal(k[7], (B2, NUM_CLASSES), dtype=jnp.float32)
    labels2 = jax.random.randint(k[8], (B2,), 0, NUM_CLASSES, dtype=jnp.int32)

    for dist_type in ("soft", "hard", "none"):
        loss = distillation_loss_forward(inputs2, outputs2, labels2, wt, bt,
                                         alpha=ALPHA, tau=TAU, dist_type=dist_type,
                                         tb_override=8)
        loss = jax.block_until_ready(loss)
        ref = jax.block_until_ready(
            reference_loss(inputs2, outputs2, outputs2, labels2, wt, bt,
                           ALPHA, TAU, dist_type))
        np.testing.assert_allclose(np.asarray(loss), np.asarray(ref),
                                   rtol=1e-2, atol=1e-2)

    print("KERNEL_OK")
</pallas_src>

<mosaic_0001>
module attributes {stable_mosaic.version = 11 : i64} {
  func.func @kernel(%arg0: i32, %arg1: memref<2x48x16xf32, #tpu.memory_space<vmem>>, %arg2: memref<1x16xf32, #tpu.memory_space<vmem>>, %arg3: memref<48x10xf32, #tpu.memory_space<vmem>>, %arg4: memref<1x10xf32, #tpu.memory_space<vmem>>, %arg5: memref<2x10xf32, #tpu.memory_space<vmem>>, %arg6: memref<2x10xf32, #tpu.memory_space<vmem>>, %arg7: memref<2x1xi32, #tpu.memory_space<vmem>>, %arg8: memref<1x1xf32, #tpu.memory_space<vmem>>, %arg9: memref<2x10xf32, #tpu.memory_space<vmem>>, %arg10: memref<2x10xf32, #tpu.memory_space<vmem>>) attributes {dimension_semantics = [#tpu.dimension_semantics<arbitrary>], iteration_bounds = array<i64: 1>, scalar_prefetch = 0 : i64, scratch_operands = 2 : i64, tpu.core_type = #tpu.core_type<tc>, window_params = [{transform_indices = @transform_0, window_bounds = array<i64: 2, 48, 16>}, {pipeline_mode = #tpu.pipeline_mode<synchronous>, transform_indices = @transform_1, window_bounds = array<i64: 1, 16>}, {pipeline_mode = #tpu.pipeline_mode<synchronous>, transform_indices = @transform_2, window_bounds = array<i64: 48, 10>}, {pipeline_mode = #tpu.pipeline_mode<synchronous>, transform_indices = @transform_3, window_bounds = array<i64: 1, 10>}, {transform_indices = @transform_4, window_bounds = array<i64: 2, 10>}, {transform_indices = @transform_5, window_bounds = array<i64: 2, 10>}, {transform_indices = @transform_6, window_bounds = array<i64: 2, 1>}, {pipeline_mode = #tpu.pipeline_mode<synchronous>, transform_indices = @transform_7, window_bounds = array<i64: 1, 1>}]} {
    %c0_i32 = arith.constant 0 : i32
    %0 = arith.cmpi eq, %arg0, %c0_i32 : i32
    %1 = arith.extui %0 : i1 to i32
    %c0_i32_0 = arith.constant 0 : i32
    %2 = arith.cmpi ne, %1, %c0_i32_0 : i32
    scf.if %2 {
      %cst_35 = arith.constant 0.000000e+00 : f32
      %80 = vector.broadcast %cst_35 : f32 to vector<2x10xf32>
      %c0_36 = arith.constant 0 : index
      %c0_37 = arith.constant 0 : index
      %81 = vector.load %arg9[%c0_36, %c0_37] : memref<2x10xf32, #tpu.memory_space<vmem>>, vector<2x10xf32>
      tpu.vector_store %arg9[%c0_36, %c0_37], %80 {strides = array<i32>} : memref<2x10xf32, #tpu.memory_space<vmem>>, vector<2x10xf32>,
      %cst_38 = arith.constant 0.000000e+00 : f32
      %82 = vector.broadcast %cst_38 : f32 to vector<2x10xf32>
      %c0_39 = arith.constant 0 : index
      %c0_40 = arith.constant 0 : index
      %83 = vector.load %arg10[%c0_39, %c0_40] : memref<2x10xf32, #tpu.memory_space<vmem>>, vector<2x10xf32>
      tpu.vector_store %arg10[%c0_39, %c0_40], %82 {strides = array<i32>} : memref<2x10xf32, #tpu.memory_space<vmem>>, vector<2x10xf32>,
    } else {
    }
    %c0 = arith.constant 0 : index
    %c0_1 = arith.constant 0 : index
    %3 = vector.load %arg5[%c0, %c0_1] : memref<2x10xf32, #tpu.memory_space<vmem>>, vector<2x10xf32>
    %c0_2 = arith.constant 0 : index
    %c0_3 = arith.constant 0 : index
    %4 = vector.load %arg6[%c0_2, %c0_3] : memref<2x10xf32, #tpu.memory_space<vmem>>, vector<2x10xf32>
    %c0_4 = arith.constant 0 : index
    %c0_5 = arith.constant 0 : index
    %5 = vector.load %arg7[%c0_4, %c0_5] : memref<2x1xi32, #tpu.memory_space<vmem>>, vector<2x1xi32>
    %6 = tpu.iota {dimensions = array<i32: 1>} : vector<2x10xi32>
    %7 = vector.broadcast %5 : vector<2x1xi32> to vector<2x10xi32>
    %8 = arith.cmpi eq, %6, %7 : vector<2x10xi32>
    %9 = arith.extui %8 : vector<2x10xi1> to vector<2x10xi32>
    %10 = arith.sitofp %9 : vector<2x10xi32> to vector<2x10xf32>
    %c0_6 = arith.constant 0 : index
    %c0_7 = arith.constant 0 : index
    %11 = vector.load %arg9[%c0_6, %c0_7] : memref<2x10xf32, #tpu.memory_space<vmem>>, vector<2x10xf32>
    %cst = arith.constant dense<0xFF800000> : vector<2xf32>
    %12 = vector.multi_reduction <maximumf>, %3, %cst [1] : vector<2x10xf32> to vector<2xf32>
    %13 = vector.shape_cast %12 : vector<2xf32> to vector<2x1xf32>
    %14 = vector.broadcast %13 : vector<2x1xf32> to vector<2x10xf32>
    %15 = arith.subf %3, %14 : vector<2x10xf32>
    %16 = math.exp %15 : vector<2x10xf32>
    %cst_8 = arith.constant dense<0.000000e+00> : vector<2xf32>
    %17 = vector.multi_reduction <add>, %16, %cst_8 [1] : vector<2x10xf32> to vector<2xf32>
    %18 = vector.shape_cast %17 : vector<2xf32> to vector<2x1xf32>
    %19 = math.log %18 : vector<2x1xf32>
    %20 = arith.addf %19, %13 : vector<2x1xf32>
    %21 = vector.broadcast %20 : vector<2x1xf32> to vector<2x10xf32>
    %22 = arith.subf %3, %21 : vector<2x10xf32>
    %23 = arith.mulf %10, %22 : vector<2x10xf32>
    %cst_9 = arith.constant 0.000000e+00 : f32
    %24 = vector.broadcast %cst_9 : f32 to vector<2x10xf32>
    %25 = arith.subf %24, %23 : vector<2x10xf32>
    %26 = arith.addf %11, %25 : vector<2x10xf32>
    %c0_10 = arith.constant 0 : index
    %c0_11 = arith.constant 0 : index
    %27 = vector.load %arg9[%c0_10, %c0_11] : memref<2x10xf32, #tpu.memory_space<vmem>>, vector<2x10xf32>
    tpu.vector_store %arg9[%c0_10, %c0_11], %26 {strides = array<i32>} : memref<2x10xf32, #tpu.memory_space<vmem>>, vector<2x10xf32>,
    %c0_12 = arith.constant 0 : index
    %c0_13 = arith.constant 0 : index
    %c0_14 = arith.constant 0 : index
    %28 = vector.load %arg1[%c0_12, %c0_13, %c0_14] : memref<2x48x16xf32, #tpu.memory_space<vmem>>, vector<2x48x16xf32>
    %c0_15 = arith.constant 0 : index
    %c0_16 = arith.constant 0 : index
    %29 = vector.load %arg2[%c0_15, %c0_16] : memref<1x16xf32, #tpu.memory_space<vmem>>, vector<1x16xf32>
    %30 = vector.shape_cast %29 : vector<1x16xf32> to vector<1x1x16xf32>
    %31 = vector.broadcast %30 : vector<1x1x16xf32> to vector<2x48x16xf32>
    %32 = arith.mulf %28, %31 : vector<2x48x16xf32>
    %cst_17 = arith.constant dense<0.000000e+00> : vector<2x48xf32>
    %33 = vector.multi_reduction <add>, %32, %cst_17 [2] : vector<2x48x16xf32> to vector<2x48xf32>
    %c0_18 = arith.constant 0 : index
    %c0_19 = arith.constant 0 : index
    %34 = vector.load %arg3[%c0_18, %c0_19] : memref<48x10xf32, #tpu.memory_space<vmem>>, vector<48x10xf32>
    %cst_20 = arith.constant dense<0.000000e+00> : vector<2x10xf32>
    %35 = tpu.matmul %33, %34, %cst_20 {dimension_numbers = #tpu.dot_dimension_numbers<[1], [0], [0], [1], [0, 0, 1, 1], [], []>} : vector<2x48xf32>, vector<48x10xf32>, vector<2x10xf32> -> vector<2x10xf32>
    %c0_21 = arith.constant 0 : index
    %c0_22 = arith.constant 0 : index
    %36 = vector.load %arg4[%c0_21, %c0_22] : memref<1x10xf32, #tpu.memory_space<vmem>>, vector<1x10xf32>
    %37 = vector.broadcast %36 : vector<1x10xf32> to vector<2x10xf32>
    %38 = arith.addf %35, %37 : vector<2x10xf32>
    %c10_i32 = arith.constant 10 : i32
    %39 = vector.broadcast %c10_i32 : i32 to vector<2x1xi32>
    %40 = arith.cmpi slt, %5, %39 : vector<2x1xi32>
    %41 = arith.extui %40 : vector<2x1xi1> to vector<2x1xi32>
    %42 = arith.sitofp %41 : vector<2x1xi32> to vector<2x1xf32>
    %cst_23 = arith.constant 2.000000e+00 : f32
    %43 = vector.broadcast %cst_23 : f32 to vector<2x10xf32>
    %44 = arith.divf %4, %43 : vector<2x10xf32>
    %cst_24 = arith.constant dense<0xFF800000> : vector<2xf32>
    %45 = vector.multi_reduction <maximumf>, %44, %cst_24 [1] : vector<2x10xf32> to vector<2xf32>
    %46 = vector.shape_cast %45 : vector<2xf32> to vector<2x1xf32>
    %47 = vector.broadcast %46 : vector<2x1xf32> to vector<2x10xf32>
    %48 = arith.subf %44, %47 : vector<2x10xf32>
    %49 = math.exp %48 : vector<2x10xf32>
    %cst_25 = arith.constant dense<0.000000e+00> : vector<2xf32>
    %50 = vector.multi_reduction <add>, %49, %cst_25 [1] : vector<2x10xf32> to vector<2xf32>
    %51 = vector.shape_cast %50 : vector<2xf32> to vector<2x1xf32>
    %52 = math.log %51 : vector<2x1xf32>
    %53 = arith.addf %52, %46 : vector<2x1xf32>
    %54 = vector.broadcast %53 : vector<2x1xf32> to vector<2x10xf32>
    %55 = arith.subf %44, %54 : vector<2x10xf32>
    %cst_26 = arith.constant 2.000000e+00 : f32
    %56 = vector.broadcast %cst_26 : f32 to vector<2x10xf32>
    %57 = arith.divf %38, %56 : vector<2x10xf32>
    %cst_27 = arith.constant dense<0xFF800000> : vector<2xf32>
    %58 = vector.multi_reduction <maximumf>, %57, %cst_27 [1] : vector<2x10xf32> to vector<2xf32>
    %59 = vector.shape_cast %58 : vector<2xf32> to vector<2x1xf32>
    %60 = vector.broadcast %59 : vector<2x1xf32> to vector<2x10xf32>
    %61 = arith.subf %57, %60 : vector<2x10xf32>
    %62 = math.exp %61 : vector<2x10xf32>
    %cst_28 = arith.constant dense<0.000000e+00> : vector<2xf32>
    %63 = vector.multi_reduction <add>, %62, %cst_28 [1] : vector<2x10xf32> to vector<2xf32>
    %64 = vector.shape_cast %63 : vector<2xf32> to vector<2x1xf32>
    %65 = math.log %64 : vector<2x1xf32>
    %66 = arith.addf %65, %59 : vector<2x1xf32>
    %67 = vector.broadcast %66 : vector<2x1xf32> to vector<2x10xf32>
    %68 = arith.subf %57, %67 : vector<2x10xf32>
    %c0_29 = arith.constant 0 : index
    %c0_30 = arith.constant 0 : index
    %69 = vector.load %arg10[%c0_29, %c0_30] : memref<2x10xf32, #tpu.memory_space<vmem>>, vector<2x10xf32>
    %70 = math.exp %68 : vector<2x10xf32>
    %71 = arith.subf %68, %55 : vector<2x10xf32>
    %72 = arith.mulf %70, %71 : vector<2x10xf32>
    %73 = vector.broadcast %42 : vector<2x1xf32> to vector<2x10xf32>
    %74 = arith.mulf %73, %72 : vector<2x10xf32>
    %75 = arith.addf %69, %74 : vector<2x10xf32>
    %c0_31 = arith.constant 0 : index
    %c0_32 = arith.constant 0 : index
    %76 = vector.load %arg10[%c0_31, %c0_32] : memref<2x10xf32, #tpu.memory_space<vmem>>, vector<2x10xf32>
    tpu.vector_store %arg10[%c0_31, %c0_32], %75 {strides = array<i32>} : memref<2x10xf32, #tpu.memory_space<vmem>>, vector<2x10xf32>,
    %c0_i32_33 = arith.constant 0 : i32
    %77 = arith.cmpi eq, %arg0, %c0_i32_33 : i32
    %78 = arith.extui %77 : i1 to i32
    %c0_i32_34 = arith.constant 0 : i32
    %79 = arith.cmpi ne, %78, %c0_i32_34 : i32
    scf.if %79 {
      %c0_35 = arith.constant 0 : index
      %c0_36 = arith.constant 0 : index
      %80 = vector.load %arg9[%c0_35, %c0_36] : memref<2x10xf32, #tpu.memory_space<vmem>>, vector<2x10xf32>
      %81 = vector.shape_cast %80 : vector<2x10xf32> to vector<1x2x10xf32>
      %cst_37 = arith.constant dense<0.000000e+00> : vector<1xf32>
      %82 = vector.multi_reduction <add>, %81, %cst_37 [1, 2] : vector<1x2x10xf32> to vector<1xf32>
      %83 = vector.shape_cast %82 : vector<1xf32> to vector<1x1x1xf32>
      %84 = vector.extract %83[0, 0, 0] : f32 from vector<1x1x1xf32>
      %cst_38 = arith.constant 2.000000e+00 : f32
      %85 = arith.divf %84, %cst_38 : f32
      %c0_39 = arith.constant 0 : index
      %c0_40 = arith.constant 0 : index
      %86 = vector.load %arg10[%c0_39, %c0_40] : memref<2x10xf32, #tpu.memory_space<vmem>>, vector<2x10xf32>
      %87 = vector.shape_cast %86 : vector<2x10xf32> to vector<1x2x10xf32>
      %cst_41 = arith.constant dense<0.000000e+00> : vector<1xf32>
      %88 = vector.multi_reduction <add>, %87, %cst_41 [1, 2] : vector<1x2x10xf32> to vector<1xf32>
      %89 = vector.shape_cast %88 : vector<1xf32> to vector<1x1x1xf32>
      %90 = vector.extract %89[0, 0, 0] : f32 from vector<1x1x1xf32>
      %cst_42 = arith.constant 4.000000e+00 : f32
      %91 = arith.mulf %90, %cst_42 : f32
      %cst_43 = arith.constant 2.000000e+01 : f32
      %92 = arith.divf %91, %cst_43 : f32
      %cst_44 = arith.constant 5.000000e-01 : f32
      %93 = arith.mulf %85, %cst_44 : f32
      %cst_45 = arith.constant 5.000000e-01 : f32
      %94 = arith.mulf %92, %cst_45 : f32
      %95 = arith.addf %93, %94 : f32
      %96 = vector.broadcast %95 : f32 to vector<1x1xf32>
      %c0_46 = arith.constant 0 : index
      %c0_47 = arith.constant 0 : index
      %97 = vector.load %arg8[%c0_46, %c0_47] : memref<1x1xf32, #tpu.memory_space<vmem>>, vector<1x1xf32>
      tpu.vector_store %arg8[%c0_46, %c0_47], %96 {strides = array<i32>} : memref<1x1xf32, #tpu.memory_space<vmem>>, vector<1x1xf32>,
    } else {
    }
    return
  }
  func.func @transform_0(%arg0: i32) -> (i32, i32, i32) {
    %c0_i32 = arith.constant 0 : i32
    %c0_i32_0 = arith.constant 0 : i32
    %c0_i32_1 = arith.constant 0 : i32
    return %arg0, %c0_i32, %c0_i32_0 : i32, i32, i32
  }
  func.func @transform_1(%arg0: i32) -> (i32, i32) {
    %c0_i32 = arith.constant 0 : i32
    %c0_i32_0 = arith.constant 0 : i32
    %c0_i32_1 = arith.constant 0 : i32
    return %c0_i32, %c0_i32_0 : i32, i32
  }
  func.func @transform_2(%arg0: i32) -> (i32, i32) {
    %c0_i32 = arith.constant 0 : i32
    %c0_i32_0 = arith.constant 0 : i32
    %c0_i32_1 = arith.constant 0 : i32
    return %c0_i32, %c0_i32_0 : i32, i32
  }
  func.func @transform_3(%arg0: i32) -> (i32, i32) {
    %c0_i32 = arith.constant 0 : i32
    %c0_i32_0 = arith.constant 0 : i32
    %c0_i32_1 = arith.constant 0 : i32
    return %c0_i32, %c0_i32_0 : i32, i32
  }
  func.func @transform_4(%arg0: i32) -> (i32, i32) {
    %c0_i32 = arith.constant 0 : i32
    %c0_i32_0 = arith.constant 0 : i32
    return %arg0, %c0_i32 : i32, i32
  }
  func.func @transform_5(%arg0: i32) -> (i32, i32) {
    %c0_i32 = arith.constant 0 : i32
    %c0_i32_0 = arith.constant 0 : i32
    return %arg0, %c0_i32 : i32, i32
  }
  func.func @transform_6(%arg0: i32) -> (i32, i32) {
    %c0_i32 = arith.constant 0 : i32
    %c0_i32_0 = arith.constant 0 : i32
    return %arg0, %c0_i32 : i32, i32
  }
  func.func @transform_7(%arg0: i32) -> (i32, i32) {
    %c0_i32 = arith.constant 0 : i32
    %c0_i32_0 = arith.constant 0 : i32
    %c0_i32_1 = arith.constant 0 : i32
    return %c0_i32, %c0_i32_0 : i32, i32
  }
}

</mosaic_0001>

<bundles_post_ra>
// kernel: distillation_loss_forward.1
= control target key start
LH: loop header
LB: loop body
LE: loop exit
PB: predicated region body
PF: predicated region fallthrough
CT: control target
= control target key end

     0   :  { %vm95_vm0 = vcmask 130048   ;;  %s655_s0 = inlined_call_operand.vmem [shape: f32[2,48,16], index: 0, kind: input, shape index: {}]   ;;  %s656_s1 = inlined_call_operand.vmem [shape: f32[1,16], index: 1, kind: input, shape index: {}]   ;;  %s657_s2 = inlined_call_operand.vmem [shape: f32[48,10], index: 2, kind: input, shape index: {}]   ;;  %s658_s3 = inlined_call_operand.vmem [shape: f32[1,10], index: 3, kind: input, shape index: {}]   ;;  %s659_s4 = inlined_call_operand.vmem [shape: f32[2,10], index: 4, kind: input, shape index: {}]   ;;  %s660_s5 = inlined_call_operand.vmem [shape: f32[2,10], index: 5, kind: input, shape index: {}]   ;;  %s661_s6 = inlined_call_operand.vmem [shape: s32[2,1], index: 6, kind: input, shape index: {}]   ;;  %s662_s7 = inlined_call_operand.hbm [shape: f32[1,1], index: 7, kind: output, shape index: {}]  }
   0x1   :  { %v70_v0 = vld [vmem:[%s655_s0 + $0x30] sm:$0xff]  ;;  %v398_v1 = vld [vmem:[%s656_s1] ss:$0 sm:$0xff]  ;;  %v71_v5 = vld [vmem:[%s655_s0 + $0x38] sm:$0xff] }
   0x2   :  { %v64_v2 = vld [vmem:[%s655_s0] sm:$0xff]  ;;  %v89_v3 = vmul.f32 %v398_v1, %v70_v0  ;;  %v65_v6 = vld [vmem:[%s655_s0 + $0x8] sm:$0xff]  ;;  %v90_v7 = vmul.f32 %v398_v1, %v71_v5  ;;  %v66_v10 = vld [vmem:[%s655_s0 + $0x10] sm:$0xff] }
   0x3   :  { %v83_v4 = vmul.f32 %v398_v1, %v64_v2  ;;  %v84_v8 = vmul.f32 %v398_v1, %v65_v6  ;;  %v72_v9 = vld [vmem:[%s655_s0 + $0x40] sm:$0xff] }
   0x4   :  { %v114_v11 = vsel %vm95_vm0, %v89_v3, 0.0 }
   0x5   :  { %v96_v12 = vsel %vm95_vm0, %v83_v4, 0.0  ;;  %115 = vadd.xlane.f32.xlu1 %v114_v11 }
   0x6   :  { %97 = vadd.xlane.f32.xlu0 %v96_v12 }
   0x7   :  { %12 = vsyncpa [#allocation5], 0  ;;  %v117_v13 = vsel %vm95_vm0, %v90_v7, 0.0  ;;  %v99_v14 = vsel %vm95_vm0, %v84_v8, 0.0  ;;  %v91_v15 = vmul.f32 %v398_v1, %v72_v9  ;;  %v85_v16 = vmul.f32 %v398_v1, %v66_v10  ;;  %v73_v17 = vld [vmem:[%s655_s0 + $0x48] sm:$0xff]  ;;  %v67_v18 = vld [vmem:[%s655_s0 + $0x18] sm:$0xff] }
   0x8   :  { %v92_v21 = vmul.f32 %v398_v1, %v73_v17  ;;  %v86_v22 = vmul.f32 %v398_v1, %v67_v18  ;;  %v74_v23 = vld [vmem:[%s655_s0 + $0x50] sm:$0xff]  ;;  %v68_v24 = vld [vmem:[%s655_s0 + $0x20] sm:$0xff]  ;;  %v75_v29 = vld [vmem:[%s655_s0 + $0x58] sm:$0xff]  ;;  %v482_v40 = vmov 0.0|0.0   ;;  %vm31_vm1 = vcmask 74752   ;;  %s486_s23 = smov [#allocation4]  }
   0x9   :  { %118 = vadd.xlane.f32.xlu1 %v117_v13  ;;  %v120_v19 = vsel %vm95_vm0, %v91_v15, 0.0  ;;  %v102_v20 = vsel %vm95_vm0, %v85_v16, 0.0  ;;  %v93_v27 = vmul.f32 %v398_v1, %v74_v23  ;;  %v87_v28 = vmul.f32 %v398_v1, %v68_v24  ;;  %v69_v30 = vld [vmem:[%s655_s0 + $0x28] sm:$0xff]  ;;  %v132_v37 = vld [vmem:[%s657_s2] sm:$0xff]  ;;  %424 = vmatprep.subr.bf16.mxu0 %v482_v40  ;;  %v134_v41 = vld [vmem:[%s657_s2 + $0x10] sm:$0xff]  ;;  %s389_s24 = sshll.u32 %s486_s23, 4  ;;  %s390_s24 = int_to_ptr.vmem [resolvable:$true] %s389_s24 }
   0xa   :  { %100 = vadd.xlane.f32.xlu0 %v99_v14  ;;  %v123_v25 = vsel %vm95_vm0, %v92_v21, 0.0  ;;  %v105_v26 = vsel %vm95_vm0, %v86_v22, 0.0  ;;  %v94_v33 = vmul.f32 %v398_v1, %v75_v29  ;;  %v88_v34 = vmul.f32 %v398_v1, %v69_v30  ;;  %v133_v38 = vld [vmem:[%s657_s2 + $0x8] sm:$0xff]  ;;  %v135_v42 = vld [vmem:[%s657_s2 + $0x18] sm:$0xff]  ;;  %v136_v44 = vld [vmem:[%s657_s2 + $0x20] sm:$0xff]  ;;  %s458_s26 = scalar_lea.vmem %s390_s24, 16  ;;  %p463_p1 = scmp.lt.s32.totalorder %s390_s24, %s390_s24 }
   0xb   :  { %v126_v31 = vsel %vm95_vm0, %v93_v27, 0.0  ;;  %v108_v32 = vsel %vm95_vm0, %v87_v28, 0.0  ;;  %v425_v39 = vpack.c.bf16 %v133_v38, %v132_v37  ;;  %v428_v43 = vpack.c.bf16 %v135_v42, %v134_v41  ;;  %v137_v45 = vld [vmem:[%s657_s2 + $0x28] sm:$0xff]  ;;  %v35_v48 = vld [vmem:[%s660_s5] sm:$0x3]  ;;  %p459_p0 = scmp.ne.s32.totalorder %s390_s24, %s458_s26  ;;  %s462_s27 = scalar_lea.vmem %s390_s24, 32 }
   0xc   :  { %v129_v35 = vsel %vm95_vm0, %v94_v33, 0.0  ;;  %v111_v36 = vsel %vm95_vm0, %v88_v34, 0.0  ;;  %v431_v46 = vpack.c.bf16 %v137_v45, %v136_v44  ;;  %v483_v47 = vmov 0.0   ;;  %v34_v44 = vld [vmem:[%s659_s4] sm:$0x3]  ;;  %p464_p2 = scmp.lt.s32.totalorder %s462_s27, %s458_s26 }
   0xd   :  { %121 = vadd.xlane.f32.xlu1 %v120_v19  ;;  %426 = vmatpush3.bf16.msra.mxu0 %v425_v39  ;;  %32 = vst.msk [vmem:[#allocation2] sm:$0x3] %vm31_vm1, %v483_v47  ;;  %vm484_vm2 = vmmov 0   ;;  %33 = vst.msk [vmem:[#allocation3] sm:$0x3] %vm31_vm1, %v483_v47  ;;  %v604_v49 = vmul.f32 0.5, %v35_v48  ;;  %v37_v53 = vlaneseq }
   0xe   :  { %103 = vadd.xlane.f32.xlu0 %v102_v20  ;;  %427 = vmatprep.subr.bf16.mxu0 %v482_v40  ;;  %vm166_vm3 = vcmask 130112   ;;  %vm173_vm4 = vcmask 195712   ;;  %vm180_vm5 = vcmask 261312   ;;  %vm187_vm6 = vcmask 326912   ;;  %v399_v39 = vld [vmem:[%s658_s3] ss:$0 sm:$0xff]  ;;  %p465_p3 = por %p464_p2, %p463_p1 }
   0xf   :  { %421 = vmatprep.mubr.msk.f32.mxu0 %vm484_vm2, %v483_v47  ;;  %v305_v50 = vsel %vm31_vm1, %v604_v49, -inf  ;;  %v608_v56 = vand.u32 127, %v37_v53  ;;  %v158_v61 = vshrl.u32 %v37_v53, 7  ;;  %vm194_vm7 = vcmask 392512  }
  0x10   :  { %vm225_vm8 = vcmask 1041409   ;;  %vm227_vm9 = vcmask 392192   ;;  %vm381_vm12 = vcmask 0   ;;  %p466_p4 = pnand %p465_p3, %p459_p0 }
  0x11   :  { %124 = vadd.xlane.f32.xlu1 %v123_v25  ;;  %429 = vmatpush3.bf16.msra.mxu0 %v428_v43  ;;  %v161_v57 = vadd.s32 4294967288, %v608_v56  ;;  %v168_v59 = vadd.s32 4294967280, %v608_v56  ;;  %v175_v62 = vadd.s32 4294967272, %v608_v56  ;;  %v182_v63 = vadd.s32 4294967264, %v608_v56 }
  0x12   :  { %106 = vadd.xlane.f32.xlu0 %v105_v26  ;;  %430 = vmatprep.subr.bf16.mxu0 %v482_v40  ;;  %v189_v4 = vadd.s32 4294967256, %v608_v56  ;;  %v159_v5 = vsub.s32 %v608_v56, %v158_v61 }
  0x13   :  { %v164_v0 = vsub.s32 %v161_v57, %v158_v61  ;;  %v171_v1 = vsub.s32 %v168_v59, %v158_v61  ;;  %v178_v6 = vsub.s32 %v175_v62, %v158_v61  ;;  %v185_v7 = vsub.s32 %v182_v63, %v158_v61 }
  0x14   :  { %v192_v14 = vsub.s32 %v189_v4, %v158_v61 }
  0x15   :  { %127 = vadd.xlane.f32.xlu1 %v126_v31  ;;  %432 = vmatpush3.bf16.msra.mxu0 %v431_v46  ;;  %v47_v46 = vsel %vm31_vm1, %v34_v44, -inf }
  0x16   :  { %109 = vadd.xlane.f32.xlu0 %v108_v32 }
  0x19   :  { %130 = vadd.xlane.f32.xlu1 %v129_v35 }
  0x1a   :  { %112 = vadd.xlane.f32.xlu0 %v111_v36 }
  0x1d   :  { %306 = vmax.xlane.f32.xlu1 %v305_v50 }
  0x92   :  { %v116_v51 = vpop.xlane.xlu1 %115 }
  0x93   :  { %v98_v52 = vpop.xlane.xlu0 %97  ;;  %v199_v15 = vrot.slane %v116_v51, %v159_v5  ;;  %v36_v51 = vld [vmem:[%s661_s6] sm:$0x3] }
  0x94   :  { %v160_v16 = vrot.slane %v98_v52, %v159_v5  ;;  %v485_v52 = vmov 0   ;;  %vm300_vm10 = vcmp.lt.s32.totalorder %v36_v51, 10 }
  0x95   :  { %442 = vset.pattern.permute.xlu0 %v485_v52  ;;  %443 = vset.pattern.permute.xlu1 %v485_v52 }
  0x96   :  { %v119_v54 = vpop.xlane.xlu1 %118 }
  0x97   :  { %v101_v55 = vpop.xlane.xlu0 %100  ;;  %v203_v8 = vrot.slane %v119_v54, %v164_v0 }
  0x98   :  { %v165_v9 = vrot.slane %v101_v55, %v164_v0  ;;  %v401_v0 = vsel %vm300_vm10, 1.0, %v483_v47 }
  0x99   :  { %v204_v21 = vsel %vm166_vm3, %v203_v8, %v199_v15 }
  0x9a   :  { %v122_v58 = vpop.xlane.xlu1 %121  ;;  %v167_v22 = vsel %vm166_vm3, %v165_v9, %v160_v16 }
  0x9b   :  { %v104_v60 = vpop.xlane.xlu0 %103  ;;  %v208_v10 = vrot.slane %v122_v58, %v171_v1 }
  0x9c   :  { %v172_v11 = vrot.slane %v104_v60, %v171_v1 }
  0x9d   :  { %v209_v23 = vsel %vm173_vm4, %v208_v10, %v204_v21 }
  0x9e   :  { %v125_v2 = vpop.xlane.xlu1 %124  ;;  %v174_v24 = vsel %vm173_vm4, %v172_v11, %v167_v22 }
  0x9f   :  { %v107_v3 = vpop.xlane.xlu0 %106  ;;  %v213_v17 = vrot.slane %v125_v2, %v178_v6 }
  0xa0   :  { %v179_v18 = vrot.slane %v107_v3, %v178_v6 }
  0xa1   :  { %v214_v27 = vsel %vm180_vm5, %v213_v17, %v209_v23 }
  0xa2   :  { %v128_v12 = vpop.xlane.xlu1 %127  ;;  %v181_v28 = vsel %vm180_vm5, %v179_v18, %v174_v24 }
  0xa3   :  { %v110_v13 = vpop.xlane.xlu0 %109  ;;  %v218_v19 = vrot.slane %v128_v12, %v185_v7 }
  0xa4   :  { %v186_v20 = vrot.slane %v110_v13, %v185_v7 }
  0xa5   :  { %v219_v31 = vsel %vm187_vm6, %v218_v19, %v214_v27  ;;  %v45_v19 = vld [vmem:[#allocation2] sm:$0x3] }
  0xa6   :  { %v131_v25 = vpop.xlane.xlu1 %130  ;;  %v188_v32 = vsel %vm187_vm6, %v186_v20, %v181_v28 }
  0xa7   :  { %v113_v26 = vpop.xlane.xlu0 %112  ;;  %v223_v29 = vrot.slane %v131_v25, %v192_v14 }
  0xa8   :  { %v193_v30 = vrot.slane %v113_v26, %v192_v14  ;;  %v332_v26 = vld [vmem:[#allocation3] sm:$0x3] }
  0xa9   :  { %v224_v33 = vsel %vm194_vm7, %v223_v29, %v219_v31 }
  0xaa   :  { %v195_v34 = vsel %vm194_vm7, %v193_v30, %v188_v32  ;;  %v307_v36 = vpop.xlane.xlu1 %306 }
  0xab   :  { %v226_v35 = vsel %vm225_vm8, %v224_v33, %v195_v34  ;;  %v308_v37 = vsub.f32 %v604_v49, %v307_v36 }
  0xac   :  { %422 = vmatmul.mubr.msk.f32.vlgmr.msra.gmra.mrb[0].mxu0 %vm227_vm9, %v226_v35 }
  0xad   :  { %v309_v38 = vmul.f32 1.442695, %v308_v37 }
  0xaf   :  { %444 = vpow2.f32 %v309_v38 }
  0xb9   :  { %v445_v48 = vpop.eup %444 }
  0xba   :  { %v311_v50 = vsel %vm31_vm1, %v445_v48, 0.0 }
 0x17f   :  { %v296_v40 = vpop.f32.mrb[0].mxu0 }
 0x180   :  { %v297_v41 = vadd.f32 %v399_v39, %v296_v40  ;;  %v423_v42 = vpop.f32.mrb[1].mxu0 }
 0x182   :  { %v318_v43 = vmul.f32 0.5, %v297_v41 }
 0x184   :  { %v319_v45 = vsel %vm31_vm1, %v318_v43, -inf }
 0x185   :  { %320 = vmax.xlane.f32.xlu0 %v319_v45 }
 0x189   :  { %48 = vmax.xlane.f32.xlu0 %v47_v46 }
 0x18d   :  { %312 = vadd.xlane.f32.xlu0 %v311_v50 }
 0x1a3   :  { %40 = vperm.xlu0 %442, %v36_v51  }
 0x212   :  { %v321_v53 = vpop.xlane.xlu0 %320 }
 0x213   :  { %v322_v54 = vsub.f32 %v318_v43, %v321_v53 }
 0x215   :  { %v323_v55 = vmul.f32 1.442695, %v322_v54 }
 0x216   :  { %v49_v57 = vpop.xlane.xlu0 %48 }
 0x217   :  { %446 = vpow2.f32 %v323_v55  ;;  %v50_v58 = vsub.f32 %v34_v44, %v49_v57 }
 0x219   :  { %v51_v59 = vmul.f32 1.442695, %v50_v58 }
 0x21a   :  { %v313_v2 = vpop.xlane.xlu0 %312 }
 0x21b   :  { %448 = vpow2.f32 %v51_v59 }
 0x221   :  { %v447_v60 = vpop.eup %446 }
 0x222   :  { %v325_v61 = vsel %vm31_vm1, %v447_v60, 0.0  ;;  %v41_v6 = vpop.permute.xlu0 %40 }
 0x223   :  { %326 = vadd.xlane.f32.xlu1 %v325_v61  ;;  %vm42_vm11 = vcmp.eq.s32.totalorder %v608_v56, %v41_v6 }
 0x224   :  { %v397_v15 = vsel %vm42_vm11, 1.0, %v483_v47 }
 0x225   :  { %v449_v62 = vpop.eup %448 }
 0x226   :  { %v53_v63 = vsel %vm31_vm1, %v449_v62, 0.0 }
 0x227   :  { %54 = vadd.xlane.f32.xlu1 %v53_v63 }
 0x238   :  { %339 = vperm.xlu1 %443, %v401_v0  }
 0x2b0   :  { %v327_v1 = vpop.xlane.xlu1 %326 }
 0x2b1   :  { %450 = vlog2.f32 %v327_v1 }
 0x2b4   :  { %v55_v3 = vpop.xlane.xlu1 %54 }
 0x2b5   :  { %452 = vlog2.f32 %v55_v3 }
 0x2b6   :  { %454 = vlog2.f32 %v313_v2 }
 0x2b8   :  { %v340_v56 = vpop.permute.xlu1 %339 }
 0x2bb   :  { %v451_v4 = vpop.eup %450 }
 0x2bc   :  { %v329_v5 = vmul.f32 0.6931472, %v451_v4 }
 0x2be   :  { %v330_v7 = vadd.f32 %v329_v5, %v321_v53 }
 0x2bf   :  { %v453_v8 = vpop.eup %452 }
 0x2c0   :  { %v455_v9 = vpop.eup %454  ;;  %v57_v10 = vmul.f32 0.6931472, %v453_v8  ;;  %v331_v11 = vsub.f32 %v318_v43, %v330_v7 }
 0x2c1   :  { %v315_v14 = vmul.f32 0.6931472, %v455_v9 }
 0x2c2   :  { %v58_v12 = vadd.f32 %v57_v10, %v49_v57  ;;  %v333_v13 = vmul.f32 1.442695, %v331_v11 }
 0x2c3   :  { %v316_v18 = vadd.f32 %v315_v14, %v307_v36 }
 0x2c4   :  { %v59_v16 = vsub.f32 %v34_v44, %v58_v12  ;;  %456 = vpow2.f32 %v333_v13 }
 0x2c5   :  { %v317_v22 = vsub.f32 %v604_v49, %v316_v18 }
 0x2c6   :  { %v60_v17 = vmul.f32 %v397_v15, %v59_v16 }
 0x2c7   :  { %v335_v23 = vsub.f32 %v331_v11, %v317_v22 }
 0x2c8   :  { %v61_v20 = vsub.f32 0.0, %v60_v17 }
 0x2ca   :  { %v62_v21 = vadd.f32 %v61_v20, %v45_v19 }
 0x2cc   :  { %63 = vst.msk [vmem:[#allocation2] sm:$0x3] %vm31_vm1, %v62_v21 }
 0x2ce   :  { %v457_v24 = vpop.eup %456 }
 0x2cf   :  { %v336_v25 = vmul.f32 %v457_v24, %v335_v23 }
 0x2d1   :  { %v342_v27 = vmul.f32 %v340_v56, %v336_v25 }
 0x2d3   :  { %v343_v28 = vadd.f32 %v342_v27, %v332_v26  ;;  %v348_v29 = vld [vmem:[#allocation2] sm:$0x3] }
 0x2d4   :  { %v349_v47 = vsel %vm31_vm1, %v348_v29, 0.0 }
 0x2d5   :  { %344 = vst.msk [vmem:[#allocation3] sm:$0x3] %vm31_vm1, %v343_v28  ;;  %350 = vadd.xlane.f32.xlu1 %v349_v47 }
 0x2dc   :  { %v362_v30 = vld [vmem:[#allocation3] sm:$0x3] }
 0x2dd   :  { %v363_v31 = vsel %vm31_vm1, %v362_v30, 0.0 }
 0x2de   :  { %364 = vadd.xlane.f32.xlu0 %v363_v31 }
 0x362   :  { %v351_v49 = vpop.xlane.xlu1 %350 }
 0x363   :  { %v352_v32 = vrot.slane %v351_v49, 4 }
 0x365   :  { %v353_v33 = vadd.f32 %v352_v32, %v351_v49 }
 0x367   :  { %v354_v34 = vrot.slane %v353_v33, 2 }
 0x369   :  { %v355_v35 = vadd.f32 %v354_v34, %v353_v33 }
 0x36b   :  { %v365_v36 = vpop.xlane.xlu0 %364  ;;  %v356_v37 = vrot.slane %v355_v35, 1 }
 0x36c   :  { %v366_v38 = vrot.slane %v365_v36, 4 }
 0x36d   :  { %v357_v39 = vadd.f32 %v356_v37, %v355_v35 }
 0x36e   :  { %v367_v40 = vadd.f32 %v366_v38, %v365_v36 }
 0x36f   :  { %433 = vpush %v357_v39 }
 0x370   :  { %v368_v41 = vrot.slane %v367_v40, 2 }
 0x372   :  { %v369_v42 = vadd.f32 %v368_v41, %v367_v40 }
 0x374   :  { %v370_v43 = vrot.slane %v369_v42, 1 }
 0x376   :  { %v371_v44 = vadd.f32 %v370_v43, %v369_v42 }
 0x378   :  { %435 = vpush %v371_v44 }
 0x3a0   :  { %s434_s4 = spop %433 }
 0x3a1   :  { %s361_s6 = smul.f32 0.5, %s434_s4 }
 0x3a3   :  { %s377_s21 = smul.f32 0.5, %s361_s6 }
 0x3a9   :  { %s436_s18 = spop %435 }
 0x3aa   :  { %s373_s19 = smul.f32 4.0, %s436_s18 }
 0x3ac   :  { %s376_s20 = smul.f32 0.05, %s373_s19 }
 0x3ae   :  { %s378_s22 = smul.f32 0.5, %s376_s20 }
 0x3b0   :  { %s379_s25 = sadd.f32 %s378_s22, %s377_s21 }
 0x3b2   :  { %v380_v45 = vstv %s379_s25 }
 0x3b3   :  { %382 = vst.msk [vmem:[#allocation4] sm:$0x1] %vm381_vm12, %v380_v45 }
 0x3b4   :  { %469 = shalt.err (!%p466_p4)
}
 0x3b5   :  { %s470_s29 = scalar_lea.hbm %s662_s7, 16 }
 0x3b6   :  { %p471_p5 = scmp.ne.s32.totalorder %s662_s7, %s470_s29  ;;  %p474_p6 = scmp.lt.u32.totalorder %s470_s29, %s662_s7 }
 0x3b8   :  { %p476_p7 = pnand %p474_p6, %p471_p5 }
 0x3ba   :  { %479 = shalt.err (!%p476_p7)
}
 0x3bb   :  { %392 = dma.vmem_to_hbm [thread:$0]  %s390_s24, 16, %s662_s7, [#allocation5]  }
 0x3bc   :  { %480 = dma.done.wait [#allocation5], 16  }
 0x3bd   :  { %481 = vsyncadd [#allocation5], 4294967280 }
 0x3be   :  { %396 = vsyncpa [#allocation5], 1 }

</bundles_post_ra>
